<compile_context>
chip_gen: v6e
topology: v6e:2x2x1
jax: 0.10.0
libtpu: 0.0.40
codegen_flags: <defaults>
</compile_context>

<pallas_src>
import functools

import jax
import jax.numpy as jnp
from jax import lax
from jax.experimental import pallas as pl
from jax.experimental.pallas import tpu as pltpu

LANE = 128


def _round_up(x, m):
    return ((x + m - 1) // m) * m


def _pick_row_tile(n):
    # Largest 8-multiple divisor of n that still yields >= 2 row tiles, so the
    # "parallel" grid axis can actually be split across v7x's two TensorCores.
    for t in (512, 256, 128, 64, 32, 16, 8):
        if n % t == 0 and t < n:
            return t
    return n


def _conv1_proj_kernel(agg_first, a_ref, x_ref, w1_ref, b1_ref, w2_ref, p_ref):
    """Per row-tile: P = relu(aggregate(X) @ W1 + b1) @ W2  (all MXU in bf16)."""
    if agg_first:
        # Fin <= H: (A @ X) @ W1 — the N^2 matmul contracts over Fin, not H.
        ax = jnp.dot(a_ref[...], x_ref[...], preferred_element_type=jnp.float32)
        h = jnp.dot(ax.astype(jnp.bfloat16), w1_ref[...],
                    preferred_element_type=jnp.float32)
    else:
        # Fin > H (Cora-like): A @ (X @ W1). (XW1 recomputed per row tile;
        # acceptable at moderate N — hoist for huge graphs.)
        xw = jnp.dot(x_ref[...], w1_ref[...], preferred_element_type=jnp.float32)
        h = jnp.dot(a_ref[...], xw.astype(jnp.bfloat16),
                    preferred_element_type=jnp.float32)

    h = jnp.maximum(h + b1_ref[...], 0.0)
    # TODO(synk): F.dropout(x, training=self.training) is identity in eval mode;
    #             training-mode random mask intentionally omitted.

    # Fold the (row-local) W2 projection in here so call 2 only aggregates.
    p_ref[...] = jnp.dot(h.astype(jnp.bfloat16), w2_ref[...],
                         preferred_element_type=jnp.float32).astype(jnp.bfloat16)


def _agg2_logsoftmax_kernel(num_classes, a_ref, p_ref, b2_ref, o_ref):
    """Per row-tile: Z = A @ P + b2, then log_softmax over the real classes."""
    z = jnp.dot(a_ref[...], p_ref[...], preferred_element_type=jnp.float32)
    z = z + b2_ref[...]
    # Padded class lanes must not affect max / sum.
    col = lax.broadcasted_iota(jnp.int32, z.shape, 1)
    z = jnp.where(col < num_classes, z, jnp.float32(-1e30))
    m = jnp.max(z, axis=1, keepdims=True)
    s = z - m
    lse = jnp.log(jnp.sum(jnp.exp(s), axis=1, keepdims=True))
    o_ref[...] = s - lse  # lane-dense (TILE_N, 128) store; wrapper slices [:, :C]


def gcn_forward(a_hat, x, w1, b1, w2, b2):
    n, in_c = x.shape
    h_c = w1.shape[1]
    out_c = w2.shape[1]

    fin_p = _round_up(in_c, LANE)
    h_p = _round_up(h_c, LANE)
    c_p = _round_up(out_c, LANE)
    tile_n = _pick_row_tile(n)
    grid = (n // tile_n,)

    # Zero-pad feature/class dims to full 128-lane tiles (exact for matmuls).
    x_p = jnp.zeros((n, fin_p), jnp.bfloat16).at[:, :in_c].set(x.astype(jnp.bfloat16))
    w1_p = jnp.zeros((fin_p, h_p), jnp.bfloat16).at[:in_c, :h_c].set(w1.astype(jnp.bfloat16))
    b1_p = jnp.zeros((1, h_p), jnp.float32).at[:, :h_c].set(b1.reshape(1, -1).astype(jnp.float32))
    w2_p = jnp.zeros((h_p, c_p), jnp.bfloat16).at[:h_c, :out_c].set(w2.astype(jnp.bfloat16))
    b2_p = jnp.zeros((1, c_p), jnp.float32).at[:, :out_c].set(b2.reshape(1, -1).astype(jnp.float32))
    a_bf = a_hat.astype(jnp.bfloat16)

    agg_first = in_c <= h_c  # static branch on (unpadded) shapes

    cparams = pltpu.CompilerParams(
        dimension_semantics=("parallel",),   # row tiles are independent (megacore on v7x)
        vmem_limit_bytes=48 << 20,           # headroom on v7x's 64 MiB VMEM
    )

    # Call 1: per row tile, P = relu((A@X)@W1 + b1) @ W2   -> (N, C_pad) bf16
    p = pl.pallas_call(
        functools.partial(_conv1_proj_kernel, agg_first),
        out_shape=jax.ShapeDtypeStruct((n, c_p), jnp.bfloat16),
        grid=grid,
        in_specs=[
            pl.BlockSpec((tile_n, n), lambda i: (i, 0)),   # A_hat row tile (streamed)
            pl.BlockSpec((n, fin_p), lambda i: (0, 0)),    # X        (resident)
            pl.BlockSpec((fin_p, h_p), lambda i: (0, 0)),  # W1       (resident)
            pl.BlockSpec((1, h_p), lambda i: (0, 0)),      # b1       (resident)
            pl.BlockSpec((h_p, c_p), lambda i: (0, 0)),    # W2       (resident)
        ],
        out_specs=pl.BlockSpec((tile_n, c_p), lambda i: (i, 0)),
        compiler_params=cparams,
    )(a_bf, x_p, w1_p, b1_p, w2_p)

    # Call 2: per row tile, Z = A@P + b2, masked log_softmax -> (N, C_pad) f32
    z = pl.pallas_call(
        functools.partial(_agg2_logsoftmax_kernel, out_c),
        out_shape=jax.ShapeDtypeStruct((n, c_p), jnp.float32),
        grid=grid,
        in_specs=[
            pl.BlockSpec((tile_n, n), lambda i: (i, 0)),   # A_hat row tile
            pl.BlockSpec((n, c_p), lambda i: (0, 0)),      # P (resident)
            pl.BlockSpec((1, c_p), lambda i: (0, 0)),      # b2
        ],
        out_specs=pl.BlockSpec((tile_n, c_p), lambda i: (i, 0)),
        compiler_params=cparams,
    )(a_bf, p, b2_p)

    return z[:, :out_c]


def normalized_adjacency(edge_index, num_nodes):
    """Dense D^-1/2 (A + I) D^-1/2 (PyG gcn_norm with add_self_loops=True).

    Note: .set dedups duplicate edges (PyG scatter-adds edge weights); identical
    for the simple test graph below, flagged for general inputs.
    """
    src, dst = edge_index
    a = jnp.zeros((num_nodes, num_nodes), jnp.float32)
    a = a.at[dst, src].set(1.0)  # message src -> dst aggregated at dst
    a = a + jnp.eye(num_nodes, dtype=jnp.float32)
    deg = jnp.sum(a, axis=1)
    dinv = jnp.where(deg > 0, 1.0 / jnp.sqrt(deg), 0.0)
    return dinv[:, None] * a * dinv[None, :]


def reference_forward_f32(a_hat, x, w1, b1, w2, b2):
    h = jnp.maximum(a_hat @ (x @ w1) + b1[None, :], 0.0)
    z = a_hat @ (h @ w2) + b2[None, :]
    return jax.nn.log_softmax(z, axis=1)


def reference_forward_bf16_matched(a_hat, x, w1, b1, w2, b2):
    """Plain-JAX mirror of the kernel's bf16-input / f32-accumulate math."""
    bf, f32 = jnp.bfloat16, jnp.float32
    a = a_hat.astype(bf)
    ax = jnp.dot(a, x.astype(bf), preferred_element_type=f32)
    h = jnp.maximum(jnp.dot(ax.astype(bf), w1.astype(bf),
                            preferred_element_type=f32) + b1[None, :], 0.0)
    p = jnp.dot(h.astype(bf), w2.astype(bf), preferred_element_type=f32).astype(bf)
    z = jnp.dot(a, p, preferred_element_type=f32) + b2[None, :]
    return jax.nn.log_softmax(z, axis=1)


if __name__ == "__main__":
    N, IN_C, H_C, OUT_C = 64, 16, 32, 8

    key = jax.random.PRNGKey(0)
    kx, ke, kw1, kw2 = jax.random.split(key, 4)

    # Node features
    x = jax.random.normal(kx, (N, IN_C), dtype=jnp.float32)

    # Deterministic undirected graph: ring + random chords (both directions)
    ring_src = jnp.arange(N, dtype=jnp.int32)
    ring_dst = (ring_src + 1) % N
    chord_src = jax.random.randint(ke, (32,), 0, N, dtype=jnp.int32)
    chord_dst = (chord_src + 7) % N
    src = jnp.concatenate([ring_src, ring_dst, chord_src, chord_dst])
    dst = jnp.concatenate([ring_dst, ring_src, chord_dst, chord_src])
    edge_index = jnp.stack([src, dst], axis=0)

    a_hat = normalized_adjacency(edge_index, N)

    # GCNConv parameters (glorot-ish deterministic init), W: (in, out), b: (out,)
    w1 = jax.random.normal(kw1, (IN_C, H_C), dtype=jnp.float32) * (1.0 / jnp.sqrt(IN_C))
    b1 = jnp.zeros((H_C,), jnp.float32)
    w2 = jax.random.normal(kw2, (H_C, OUT_C), dtype=jnp.float32) * (1.0 / jnp.sqrt(H_C))
    b2 = jnp.zeros((OUT_C,), jnp.float32)

    out = gcn_forward(a_hat, x, w1, b1, w2, b2)
    out = jax.block_until_ready(out)
    assert out.shape == (N, OUT_C)
    assert jnp.all(jnp.isfinite(out)), "non-finite output"

    # Tight check against a reference that applies the same bf16 input rounding.
    ref_m = reference_forward_bf16_matched(a_hat, x, w1, b1, w2, b2)
    assert jnp.allclose(out, ref_m, atol=2e-3, rtol=2e-3), "mismatch vs bf16-matched reference"

    # Looser sanity check against the full-f32 reference (bf16 MXU inputs).
    ref_f = reference_forward_f32(a_hat, x, w1, b1, w2, b2)
    assert jnp.allclose(out, ref_f, atol=5e-2, rtol=5e-2), "mismatch vs f32 reference"

    print("KERNEL_OK")
</pallas_src>

<mosaic_0001>
module attributes {stable_mosaic.version = 11 : i64} {
  func.func @_conv1_proj_kernel(%arg0: i32, %arg1: memref<32x64xbf16, #tpu.memory_space<vmem>>, %arg2: memref<64x128xbf16, #tpu.memory_space<vmem>>, %arg3: memref<128x128xbf16, #tpu.memory_space<vmem>>, %arg4: memref<1x128xf32, #tpu.memory_space<vmem>>, %arg5: memref<128x128xbf16, #tpu.memory_space<vmem>>, %arg6: memref<32x128xbf16, #tpu.memory_space<vmem>>) attributes {dimension_semantics = [#tpu.dimension_semantics<parallel>], iteration_bounds = array<i64: 2>, scalar_prefetch = 0 : i64, scratch_operands = 0 : i64, tpu.core_type = #tpu.core_type<tc>, window_params = [{transform_indices = @transform_0, window_bounds = array<i64: 32, 64>}, {pipeline_mode = #tpu.pipeline_mode<synchronous>, transform_indices = @transform_1, window_bounds = array<i64: 64, 128>}, {pipeline_mode = #tpu.pipeline_mode<synchronous>, transform_indices = @transform_2, window_bounds = array<i64: 128, 128>}, {pipeline_mode = #tpu.pipeline_mode<synchronous>, transform_indices = @transform_3, window_bounds = array<i64: 1, 128>}, {pipeline_mode = #tpu.pipeline_mode<synchronous>, transform_indices = @transform_4, window_bounds = array<i64: 128, 128>}, {transform_indices = @transform_5, window_bounds = array<i64: 32, 128>}]} {
    %c0 = arith.constant 0 : index
    %c0_0 = arith.constant 0 : index
    %0 = vector.load %arg1[%c0, %c0_0] : memref<32x64xbf16, #tpu.memory_space<vmem>>, vector<32x64xbf16>
    %c0_1 = arith.constant 0 : index
    %c0_2 = arith.constant 0 : index
    %1 = vector.load %arg2[%c0_1, %c0_2] : memref<64x128xbf16, #tpu.memory_space<vmem>>, vector<64x128xbf16>
    %cst = arith.constant dense<0.000000e+00> : vector<32x128xf32>
    %2 = tpu.matmul %0, %1, %cst {dimension_numbers = #tpu.dot_dimension_numbers<[1], [0], [0], [1], [0, 0, 1, 1], [], []>} : vector<32x64xbf16>, vector<64x128xbf16>, vector<32x128xf32> -> vector<32x128xf32>
    %3 = arith.truncf %2 : vector<32x128xf32> to vector<32x128xbf16>
    %c0_3 = arith.constant 0 : index
    %c0_4 = arith.constant 0 : index
    %4 = vector.load %arg3[%c0_3, %c0_4] : memref<128x128xbf16, #tpu.memory_space<vmem>>, vector<128x128xbf16>
    %cst_5 = arith.constant dense<0.000000e+00> : vector<32x128xf32>
    %5 = tpu.matmul %3, %4, %cst_5 {dimension_numbers = #tpu.dot_dimension_numbers<[1], [0], [0], [1], [0, 0, 1, 1], [], []>} : vector<32x128xbf16>, vector<128x128xbf16>, vector<32x128xf32> -> vector<32x128xf32>
    %c0_6 = arith.constant 0 : index
    %c0_7 = arith.constant 0 : index
    %6 = vector.load %arg4[%c0_6, %c0_7] : memref<1x128xf32, #tpu.memory_space<vmem>>, vector<1x128xf32>
    %7 = vector.broadcast %6 : vector<1x128xf32> to vector<32x128xf32>
    %8 = arith.addf %5, %7 : vector<32x128xf32>
    %cst_8 = arith.constant 0.000000e+00 : f32
    %9 = vector.broadcast %cst_8 : f32 to vector<32x128xf32>
    %10 = arith.maximumf %8, %9 : vector<32x128xf32>
    %11 = arith.truncf %10 : vector<32x128xf32> to vector<32x128xbf16>
    %c0_9 = arith.constant 0 : index
    %c0_10 = arith.constant 0 : index
    %12 = vector.load %arg5[%c0_9, %c0_10] : memref<128x128xbf16, #tpu.memory_space<vmem>>, vector<128x128xbf16>
    %cst_11 = arith.constant dense<0.000000e+00> : vector<32x128xf32>
    %13 = tpu.matmul %11, %12, %cst_11 {dimension_numbers = #tpu.dot_dimension_numbers<[1], [0], [0], [1], [0, 0, 1, 1], [], []>} : vector<32x128xbf16>, vector<128x128xbf16>, vector<32x128xf32> -> vector<32x128xf32>
    %14 = arith.truncf %13 : vector<32x128xf32> to vector<32x128xbf16>
    %c0_12 = arith.constant 0 : index
    %c0_13 = arith.constant 0 : index
    %15 = vector.load %arg6[%c0_12, %c0_13] : memref<32x128xbf16, #tpu.memory_space<vmem>>, vector<32x128xbf16>
    tpu.vector_store %arg6[%c0_12, %c0_13], %14 {strides = array<i32>} : memref<32x128xbf16, #tpu.memory_space<vmem>>, vector<32x128xbf16>,
    return
  }
  func.func @transform_0(%arg0: i32) -> (i32, i32) {
    %c0_i32 = arith.constant 0 : i32
    %c0_i32_0 = arith.constant 0 : i32
    return %arg0, %c0_i32 : i32, i32
  }
  func.func @transform_1(%arg0: i32) -> (i32, i32) {
    %c0_i32 = arith.constant 0 : i32
    %c0_i32_0 = arith.constant 0 : i32
    %c0_i32_1 = arith.constant 0 : i32
    return %c0_i32, %c0_i32_0 : i32, i32
  }
  func.func @transform_2(%arg0: i32) -> (i32, i32) {
    %c0_i32 = arith.constant 0 : i32
    %c0_i32_0 = arith.constant 0 : i32
    %c0_i32_1 = arith.constant 0 : i32
    return %c0_i32, %c0_i32_0 : i32, i32
  }
  func.func @transform_3(%arg0: i32) -> (i32, i32) {
    %c0_i32 = arith.constant 0 : i32
    %c0_i32_0 = arith.constant 0 : i32
    %c0_i32_1 = arith.constant 0 : i32
    return %c0_i32, %c0_i32_0 : i32, i32
  }
  func.func @transform_4(%arg0: i32) -> (i32, i32) {
    %c0_i32 = arith.constant 0 : i32
    %c0_i32_0 = arith.constant 0 : i32
    %c0_i32_1 = arith.constant 0 : i32
    return %c0_i32, %c0_i32_0 : i32, i32
  }
  func.func @transform_5(%arg0: i32) -> (i32, i32) {
    %c0_i32 = arith.constant 0 : i32
    %c0_i32_0 = arith.constant 0 : i32
    return %arg0, %c0_i32 : i32, i32
  }
}

</mosaic_0001>

<bundles_post_ra>
// kernel: tpu_custom_call.1
= control target key start
LH: loop header
LB: loop body
LE: loop exit
PB: predicated region body
PF: predicated region fallthrough
CT: control target
= control target key end

     0   :  { %10 = vsyncpa [#allocation3], 0  ;;  %s1456_s0 = inlined_call_operand.hbm [shape: bf16[64,64], index: 0, kind: input, shape index: {}]   ;;  %s1457_s1 = inlined_call_operand.hbm [shape: bf16[64,128], index: 1, kind: input, shape index: {}]   ;;  %s1458_s2 = inlined_call_operand.hbm [shape: bf16[128,128], index: 2, kind: input, shape index: {}]   ;;  %s1459_s3 = inlined_call_operand.vmem [shape: f32[1,128], index: 3, kind: input, shape index: {}]   ;;  %s1460_s4 = inlined_call_operand.hbm [shape: bf16[128,128], index: 4, kind: input, shape index: {}]   ;;  %s1461_s5 = inlined_call_operand.hbm [shape: bf16[64,128], index: 5, kind: output, shape index: {}]  }
   0x1   :  { %12 = vsyncpa [#allocation3 + $0x1], 0 }
   0x2   :  { %13 = vsyncpa [#allocation6], 0 }
   0x3   :  { %14 = vsyncpa [#allocation9], 0 }
   0x4   :  { %15 = vsyncpa [#allocation4], 0 }
   0x5   :  { %17 = vsyncpa [#allocation4 + $0x1], 0  ;;  %s1235_s18 = smov 0   ;;  %s1237_s19 = smov 0  }
   0x6   :  { %s1239_s20 = smov 0   ;;  %s1241_s21 = smov 0  }
   0x7 LB: > { %s1256_s22 = sadd.s32 4294967295, %s1194_s21   ;;  %s769_s23 = sadd.s32 4294967294, %s1194_s21   ;;  %s1194_s21 = sphi %s1241_s21, %s1486_s21   ;;  %s1190_s20 = sphi %s1239_s20, %s1485_s20   ;;  %s1186_s19 = sphi %s1237_s19, %s1484_s19   ;;  %s1182_s18 = sphi %s1235_s18, %s1483_s18  }
   0x8   : > { %p43_p0 = scmp.ne.s32.totalorder %s1186_s19, %s1182_s18  ;;  %p1462_p1 = scmp.eq.s32.totalorder %s1256_s22, 0 }
   0x9   : > { %p151_p2 = scmp.eq.s32.totalorder %s1256_s22, 1  ;;  %p157_p3 = scmp.eq.s32.totalorder %s769_s23, 1 }
   0xa   : > { %p1265_p4 = por %p1462_p1, %p43_p0  ;;  %p770_p5 = scmp.ge.s32.totalorder %s1194_s21, 1 }
   0xb   : > { %p1270_p6 = por %p157_p3, %p43_p0  ;;  %p164_p7 = scmp.lt.s32.totalorder %s1194_s21, 3 }
   0xc   : > { %s1467_s24 = scalar_select %p1265_p4, 1, 0 }
   0xd   : > { %s1468_s25 = scalar_select %p1270_p6, 1, 0 }
   0xe   : > { %p1275_p8 = pnand %p770_p5, %p164_p7  ;;  %s1196_s27 = smov [#allocation5]  }
   0xf   : > { %s176_s28 = sshll.u32 %s1196_s27, 4  ;;  %s1197_s30 = smov [#allocation7]   ;;  %s177_s28 = int_to_ptr.vmem [resolvable:$true] %s176_s28 }
  0x10   : > { %s1469_s26 = scalar_select %p1275_p8, 1, 0 }
  0x11   : > { %p929_p9 = pneg %p1275_p8  ;;  %s189_s6 = sshll.u32 %s1197_s30, 4  ;;  %s190_s6 = int_to_ptr.vmem [resolvable:$true] %s189_s6 }
  0x12   : > { %s1198_s7 = smov [#allocation8]   ;;  %s1027_s9 = scalar_lea.vmem %s177_s28, 512 }
  0x13   : > { %p1284_p11 = pnand %p929_p9, %p1462_p1  ;;  %s205_s8 = sshll.u32 %s1198_s7, 4  ;;  %s206_s8 = int_to_ptr.vmem [resolvable:$true] %s205_s8 }
  0x14   : > { %p1028_p13 = scmp.ne.s32.totalorder %s177_s28, %s1027_s9  ;;  %p1035_p5 = scmp.lt.s32.totalorder %s177_s28, %s177_s28 }
  0x15   : > { %p1018_p12 = pneg %p1284_p11  ;;  %p1036_p7 = scmp.lt.s32.totalorder %s1027_s9, %s1027_s9 }
  0x17   : > { %p1030_p0 = pnand %p1028_p13, %p1018_p12  ;;  %p1037_p9 = por %p1036_p7, %p1035_p5 }
  0x19   : > { %p1031_p3 = pneg %p1030_p0 }
  0x1b   : > { %p1038_p10 = pnand %p1037_p9, %p1031_p3 }
  0x1d   : > { %1041 = shalt.err (!%p1038_p10)
}
  0x1e   : > { %s1463_s10 = smov 64   ;;  %s1200_s11 = smov 4  }
  0x1f   : > { %932 = dma.hbm_to_vmem [thread:$0]  (!%p1284_p11), %s1457_s1, 512, %s177_s28, [#allocation6], %s1463_s10, %s1463_s10, %s1200_s11  }
  0x20   : > { %s1053_s14 = scalar_lea.vmem %s190_s6, 1024  ;;  %p1061_p3 = scmp.lt.s32.totalorder %s190_s6, %s190_s6 }
  0x21   : > { %p1054_p13 = scmp.ne.s32.totalorder %s190_s6, %s1053_s14  ;;  %p1062_p10 = scmp.lt.s32.totalorder %s1053_s14, %s1053_s14 }
  0x23   : > { %p1056_p0 = pnand %p1054_p13, %p1018_p12  ;;  %p1063_p7 = por %p1062_p10, %p1061_p3 }
  0x25   : > { %p1057_p5 = pneg %p1056_p0 }
  0x27   : > { %p1064_p9 = pnand %p1063_p7, %p1057_p5 }
  0x29   : > { %1067 = shalt.err (!%p1064_p9)
}
  0x2a   : > { %935 = dma.hbm_to_vmem [thread:$0]  (!%p1284_p11), %s1458_s2, 1024, %s190_s6, [#allocation6], %s1463_s10, %s1463_s10, %s1200_s11  }
  0x2b   : > { %s1079_s17 = scalar_lea.vmem %s206_s8, 1024  ;;  %p1087_p3 = scmp.lt.s32.totalorder %s206_s8, %s206_s8 }
  0x2c   : > { %p1080_p1 = scmp.ne.s32.totalorder %s206_s8, %s1079_s17  ;;  %p1088_p5 = scmp.lt.s32.totalorder %s1079_s17, %s1079_s17 }
  0x2e   : > { %p1082_p13 = pnand %p1080_p1, %p1018_p12  ;;  %p1089_p10 = por %p1088_p5, %p1087_p3 }
  0x30   : > { %p1083_p0 = pneg %p1082_p13 }
  0x32   : > { %p1090_p7 = pnand %p1089_p10, %p1083_p0 }
  0x34   : > { %1093 = shalt.err (!%p1090_p7)
}
  0x35   : > { %938 = dma.hbm_to_vmem [thread:$0]  (!%p1284_p11), %s1460_s4, 1024, %s206_s8, [#allocation9], %s1463_s10, %s1463_s10, %s1200_s11  }
  0x36   : > { %s1324_s28 = sadd.s32 1, %s1194_s21   ;;  %s30_s30 = sadd.s32 1, %s1190_s20 }
  0x37   : > { %s27_s29 = ssub.s32 %s1194_s21, %s1324_s28  ;;  %p37_p12 = scmp.ne.s32.totalorder %s1190_s20, %s1186_s19 }
  0x38   : > { %p28_p1 = scmp.eq.s32.totalorder %s27_s29, 0  ;;  %p38_p9 = scmp.eq.s32.totalorder %s1194_s21, 0 }
  0x39   : > { %p950_p13 = scmp.lt.s32.totalorder %s1194_s21, 2  ;;  %p1338_p3 = por %p151_p2, %p37_p12 }
  0x3a   : > { %s1334_s6 = scalar_select %p28_p1, %s1190_s20, %s30_s30  }
  0x3b   : > { %p39_p0 = por %p38_p9, %p37_p12  ;;  %s219_s9 = sand.u32 1, %s1190_s20  }
  0x3c   : > { %s1471_s7 = scalar_select %p1338_p3, 1, 0 }
  0x3d   : > { %s818_s12 = sshll.u32 %s1194_s21, 8  ;;  %s775_s8 = sshll.u32 %s219_s9, 4 }
  0x3e   : > { %s1347_s15 = scalar_lea.hbm %s1456_s0, %s818_s12  ;;  %s223_s16 = scalar_lea.vmem [#allocation2], %s775_s8 }
  0x3f   : > { %s230_s17 = sshll.u32 %s223_s16, 4  ;;  %p1349_p11 = pnand %p950_p13, %p39_p0  ;;  %s1353_s17 = int_to_ptr.vmem [resolvable:$true] %s230_s17 }
  0x40   : > { %s1355_s27 = scalar_lea.sflag [#allocation3], %s219_s9  ;;  %s1094_s29 = scalar_lea.hbm %s1347_s15, 256 }
  0x41   : > { %p1095_p2 = scmp.ne.s32.totalorder %s1347_s15, %s1094_s29  ;;  %p1096_p5 = pneg %p1349_p11 }
  0x42   : > { %s1099_s8 = scalar_lea.hbm %s1456_s0, 512  ;;  %p1100_p1 = scmp.lt.s32.totalorder %s1347_s15, %s1456_s0 }
  0x43   : > { %p1097_p10 = pnand %p1096_p5, %p1095_p2  ;;  %p1101_p12 = scmp.lt.s32.totalorder %s1099_s8, %s1094_s29 }
  0x45   : > { %p1098_p7 = pneg %p1097_p10  ;;  %p1102_p9 = por %p1101_p12, %p1100_p1 }
  0x47   : > { %p1103_p13 = pnand %p1102_p9, %p1098_p7 }
  0x49   : > { %1106 = shalt.err (!%p1103_p13)
}
  0x4a   : > { %s1107_s9 = scalar_lea.vmem %s1353_s17, 256  ;;  %s1201_s16 = smov [#allocation2]  }
  0x4b   : > { %p1108_p0 = scmp.ne.s32.totalorder %s1353_s17, %s1107_s9  ;;  %s1112_s10 = sshll.u32 %s1201_s16, 4  ;;  %s1113_s10 = int_to_ptr.vmem [resolvable:$false] %s1112_s10 }
  0x4c   : > { %s1114_s30 = scalar_lea.vmem %s1113_s10, 512  ;;  %p1115_p10 = scmp.lt.s32.totalorder %s1353_s17, %s1113_s10 }
  0x4d   : > { %p1110_p6 = pnand %p1108_p0, %p1096_p5  ;;  %p1116_p3 = scmp.lt.s32.totalorder %s1114_s30, %s1107_s9 }
  0x4f   : > { %p1111_p2 = pneg %p1110_p6  ;;  %p1117_p4 = por %p1116_p3, %p1115_p10 }
  0x51   : > { %p1118_p8 = pnand %p1117_p4, %p1111_p2 }
  0x53   : > { %1121 = shalt.err (!%p1118_p8)
}
  0x54   : > { %s1473_s29 = smov 64   ;;  %p1474_p6 = scmp.ne.s32.totalorder %s1469_s26, 0 }
  0x55   : > { %942 = dma.hbm_to_vmem [thread:$0]  (!%p1349_p11), %s1347_s15, 256, %s1353_s17, %s1355_s27, %s1473_s29, %s1473_s29, %s1200_s11  }
  0x56   : > { %242 = sbr.rel (%p1474_p6) target bundleno = 739 (0x2e3), region = 40  ;;  %s1382_s12 = sand.u32 (!%p1474_p6), 1, %s1186_s19  }
  0x57   : > { %s779_s10 = sshll.u32 (!%p1474_p6), %s1382_s12, 4  ;;  %s245_s8 = scalar_lea.sflag (!%p1474_p6), [#allocation3], %s1382_s12 }
  0x58   : > { %s248_s23 = scalar_lea.vmem (!%p1474_p6), [#allocation2], %s779_s10  ;;  %p1475_p4 = scmp.ne.s32.totalorder (!%p1474_p6), %s1467_s24, 0 }
  0x5b   : > { %1165 = dma.done.wait (%p1475_p4), %s245_s8, 256  }
  0x5c   : > { %1167 = vsyncadd (%p1475_p4), %s245_s8, 4294967040  ;;  %p1476_p8 = scmp.eq.s32.totalorder %s1256_s22, 0 }
  0x5e   : > { %1169 = dma.done.wait (%p1476_p8), [#allocation6], 1536   ;;  %p1477_p3 = pmov %p1476_p8 }
  0x60   : > { %1171 = vsyncadd (%p1477_p3), [#allocation6], 4294965760  ;;  %p1478_p11 = pmov %p1477_p3 }
  0x61   : > { %p1479_p5 = pmov %p1477_p3 }
  0x62   : > { %1173 = dma.done.wait (%p1478_p11), [#allocation9], 1024  }
  0x63   : > { %1175 = vsyncadd (%p1479_p5), [#allocation9], 4294966272  ;;  %v994_v0 = vld [vmem:[#allocation5 + $0x18] sm:$0xff]   ;;  %v995_v1 = vld [vmem:[#allocation5 + $0x10] sm:$0xff]   ;;  %vm336_vm0 = vcmask 523264   ;;  %s286_s11 = scalar_lea.vmem [#allocation10], %s779_s10 }
  0x64   : > { %861 = vmatprep.subr.bf16.mxu0 %v994_v0  ;;  %v996_v2 = vld [vmem:[#allocation5 + $0x8] sm:$0xff]   ;;  %v998_v3 = vld [vmem:[%s248_s23] sm:$0xff]   ;;  %v1000_v4 = vld [vmem:[#allocation7 + $0x38] sm:$0xff]   ;;  %s667_s15 = sshll.u32 %s286_s11, 4  ;;  %s823_s17 = sshll.u32 %s1256_s22, 8  ;;  %s1408_s15 = int_to_ptr.vmem [resolvable:$true] %s667_s15 }
  0x65   : > { %862 = vmatpush3.bf16.msra.mxu0 %v994_v0  ;;  %869 = vmatprep.mubr.msk.bf16.mxu0 %vm336_vm0, %v998_v3  ;;  %v1001_v5 = vld [vmem:[#allocation7 + $0x30] sm:$0xff]   ;;  %v997_v6 = vld [vmem:[#allocation5] sm:$0xff]   ;;  %v1002_v7 = vld [vmem:[#allocation7 + $0x28] sm:$0xff]   ;;  %s1413_s14 = scalar_lea.hbm %s1461_s5, %s823_s17  ;;  %s654_s9 = scalar_lea.sflag [#allocation4], %s1382_s12 }
  0x66   : > { %863 = vmatprep.subr.bf16.mxu0 %v995_v1  ;;  %873 = vmatprep.subr.bf16.mxu1 %v1000_v4  ;;  %v999_v8 = vld [vmem:[%s248_s23 + $0x8] sm:$0xff]   ;;  %v1003_v9 = vld [vmem:[#allocation7 + $0x20] sm:$0xff]   ;;  %v1005_v11 = vld [vmem:[#allocation7 + $0x10] sm:$0xff]   ;;  %s1122_s16 = scalar_lea.vmem %s1408_s15, 256  ;;  %p1480_p1 = scmp.ne.s32.totalorder %s1471_s7, 0 }
  0x67   : > { %874 = vmatpush3.bf16.msra.mxu1 %v1000_v4  ;;  %v1004_v10 = vld [vmem:[#allocation7 + $0x18] sm:$0xff]   ;;  %v1006_v12 = vld [vmem:[#allocation7 + $0x8] sm:$0xff]   ;;  %v1007_v13 = vld [vmem:[#allocation7] sm:$0xff]   ;;  %p1123_p7 = scmp.ne.s32.totalorder %s1408_s15, %s1122_s16  ;;  %s1202_s22 = smov [#allocation10]  }
  0x68   : > { %875 = vmatprep.subr.bf16.mxu1 %v1001_v5  ;;  %v1008_v14 = vld [vmem:[#allocation8 + $0x38] sm:$0xff]   ;;  %v1009_v15 = vld [vmem:[#allocation8 + $0x30] sm:$0xff]   ;;  %v1010_v16 = vld [vmem:[#allocation8 + $0x28] sm:$0xff]   ;;  %s1126_s30 = sshll.u32 %s1202_s22, 4  ;;  %s1127_s30 = int_to_ptr.vmem [resolvable:$false] %s1126_s30 }
  0x69   : > { %864 = vmatpush3.bf16.msra.mxu0 %v995_v1  ;;  %v1011_v17 = vld [vmem:[#allocation8 + $0x20] sm:$0xff]   ;;  %v1012_v18 = vld [vmem:[#allocation8 + $0x18] sm:$0xff]   ;;  %v1013_v25 = vld [vmem:[#allocation8 + $0x10] sm:$0xff]   ;;  %p1124_p12 = pnand %p1123_p7, %p1480_p1  ;;  %s1128_s29 = scalar_lea.vmem %s1127_s30, 512 }
  0x6a   : > { %865 = vmatprep.subr.bf16.mxu0 %v996_v2  ;;  %v1014_v26 = vld [vmem:[#allocation8 + $0x8] sm:$0xff]   ;;  %v1015_v27 = vld [vmem:[#allocation8] sm:$0xff]   ;;  %p1129_p13 = scmp.lt.s32.totalorder %s1408_s15, %s1127_s30  ;;  %p1130_p0 = scmp.lt.s32.totalorder %s1128_s29, %s1122_s16 }
  0x6b   : > { %876 = vmatpush3.bf16.msra.mxu1 %v1001_v5  ;;  %v792_v30 = vld [vmem:[%s1459_s3] ss:$0 sm:$0xff]  ;;  %p1125_p9 = pneg %p1124_p12 }
  0x6c   : > { %877 = vmatprep.subr.bf16.mxu1 %v1002_v7  ;;  %p1131_p2 = por %p1130_p0, %p1129_p13 }
  0x6d   : > { %866 = vmatpush3.bf16.msra.mxu0 %v996_v2 }
  0x6e   : > { %867 = vmatprep.subr.bf16.mxu0 %v997_v6  ;;  %p1132_p10 = pnand %p1131_p2, %p1125_p9 }
  0x6f   : > { %878 = vmatpush3.bf16.msra.mxu1 %v1002_v7 }
  0x70   : > { %879 = vmatprep.subr.bf16.mxu1 %v1003_v9 }
  0x71   : > { %868 = vmatpush3.bf16.msra.mxu0 %v997_v6 }
  0x72   : > { %893 = vmatprep.subr.bf16.mxu0 %v1008_v14 }
  0x73   : > { %880 = vmatpush3.bf16.msra.mxu1 %v1003_v9 }
  0x74   : > { %870 = vmatmul.mubr.msk.bf16.vlgmr.msra.gmra.mxu0 %vm336_vm0, %v999_v8  ;;  %881 = vmatprep.subr.bf16.mxu1 %v1004_v10 }
  0x75   : > { %894 = vmatpush3.bf16.msra.mxu0 %v1008_v14 }
  0x76   : > { %895 = vmatprep.subr.bf16.mxu0 %v1009_v15 }
  0x77   : > { %882 = vmatpush3.bf16.msra.mxu1 %v1004_v10 }
  0x78   : > { %883 = vmatprep.subr.bf16.mxu1 %v1005_v11 }
  0x79   : > { %896 = vmatpush3.bf16.msra.mxu0 %v1009_v15 }
  0x7a   : > { %897 = vmatprep.subr.bf16.mxu0 %v1010_v16 }
  0x7b   : > { %884 = vmatpush3.bf16.msra.mxu1 %v1005_v11 }
  0x7c   : > { %885 = vmatprep.subr.bf16.mxu1 %v1006_v12 }
  0x7d   : > { %898 = vmatpush3.bf16.msra.mxu0 %v1010_v16 }
  0x7e   : > { %899 = vmatprep.subr.bf16.mxu0 %v1011_v17 }
  0x7f   : > { %886 = vmatpush3.bf16.msra.mxu1 %v1006_v12 }
  0x80   : > { %887 = vmatprep.subr.bf16.mxu1 %v1007_v13 }
  0x81   : > { %900 = vmatpush3.bf16.msra.mxu0 %v1011_v17 }
  0x82   : > { %901 = vmatprep.subr.bf16.mxu0 %v1012_v18 }
  0x83   : > { %888 = vmatpush3.bf16.msra.mxu1 %v1007_v13 }
  0x85   : > { %902 = vmatpush3.bf16.msra.mxu0 %v1012_v18 }
  0x86   : > { %903 = vmatprep.subr.bf16.mxu0 %v1013_v25 }
  0x89   : > { %904 = vmatpush3.bf16.msra.mxu0 %v1013_v25 }
  0x8a   : > { %905 = vmatprep.subr.bf16.mxu0 %v1014_v26 }
  0x8d   : > { %906 = vmatpush3.bf16.msra.mxu0 %v1014_v26 }
  0x8e   : > { %907 = vmatprep.subr.bf16.mxu0 %v1015_v27 }
  0x91   : > { %908 = vmatpush3.bf16.msra.mxu0 %v1015_v27 }
 0x134   : > { %v871_v19 = vpop.f32.mrf.mxu0 }
 0x136   : > { %v377_v20 = vpop.f32.mrf.mxu0 }
 0x138   : > { %v872_v21 = vpop.f32.mrf.mxu0 }
 0x139   : > { %v393_v24 = vpack.c.bf16 %v872_v21, %v871_v19 }
 0x13a   : > { %v380_v22 = vpop.f32.mrf.mxu0 }
 0x13b   : > { %v392_v23 = vpack.c.bf16 %v380_v22, %v377_v20 }
 0x13d   : > { %889 = vmatprep.mubr.bf16.mxu1 %v392_v23 }
 0x13e   : > { %890 = vmatmul.mubr.bf16.vlgmr.msra.gmra.mxu1 %v393_v24 }
 0x1fe   : > { %v891_v28 = vpop.f32.mrf.mxu1 }
 0x1ff   : > { %v508_v34 = vadd.f32 %v891_v28, %v792_v30 }
 0x200   : > { %v499_v29 = vpop.f32.mrf.mxu1 }
 0x201   : > { %v500_v32 = vadd.f32 %v792_v30, %v499_v29  ;;  %v516_v40 = vmax.f32 %v508_v34, 0.0 }
 0x202   : > { %v892_v31 = vpop.f32.mrf.mxu1 }
 0x203   : > { %v511_v33 = vadd.f32 %v892_v31, %v792_v30  ;;  %v514_v38 = vmax.f32 %v500_v32, 0.0 }
 0x204   : > { %v502_v35 = vpop.f32.mrf.mxu1 }
 0x205   : > { %v503_v36 = vadd.f32 %v792_v30, %v502_v35  ;;  %v517_v37 = vmax.f32 %v511_v33, 0.0 }
 0x207   : > { %v515_v39 = vmax.f32 %v503_v36, 0.0  ;;  %v519_v42 = vpack.c.bf16 %v517_v37, %v516_v40 }
 0x209   : > { %v518_v41 = vpack.c.bf16 %v515_v39, %v514_v38 }
 0x20b   : > { %909 = vmatprep.mubr.bf16.mxu0 %v518_v41 }
 0x20c   : > { %910 = vmatmul.mubr.bf16.vlgmr.msra.gmra.mxu0 %v519_v42 }
 0x2cc   : > { %v911_v43 = vpop.f32.mrf.mxu0 }
 0x2ce   : > { %v618_v44 = vpop.f32.mrf.mxu0 }
 0x2d0   : > { %v912_v45 = vpop.f32.mrf.mxu0 }
 0x2d1   : > { %v832_v46 = vpack.c.bf16 %v912_v45, %v911_v43 }
 0x2d2   : > { %v621_v47 = vpop.f32.mrf.mxu0 }
 0x2d3   : > { %834 = vst [vmem:[%s286_s11 + $0x8] sm:$0xff] %v832_v46   ;;  %v827_v48 = vpack.c.bf16 %v621_v47, %v618_v44 }
 0x2d5   : > { %828 = vst [vmem:[%s286_s11] sm:$0xff] %v827_v48  }
 0x2d6   : > { %1135 = shalt.err (!%p1132_p10)
}
 0x2d7   : > { %s1136_s10 = scalar_lea.hbm %s1413_s14, 256  ;;  %s1140_s24 = scalar_lea.hbm %s1461_s5, 512 }
 0x2d8   : > { %p1137_p6 = scmp.ne.s32.totalorder %s1413_s14, %s1136_s10  ;;  %p1141_p3 = scmp.lt.s32.totalorder %s1413_s14, %s1461_s5 }
 0x2d9   : > { %p1142_p11 = scmp.lt.s32.totalorder %s1140_s24, %s1136_s10 }
 0x2da   : > { %p1138_p4 = pnand %p1137_p6, %p1480_p1 }
 0x2db   : > { %p1143_p5 = por %p1142_p11, %p1141_p3 }
 0x2dc   : > { %p1139_p8 = pneg %p1138_p4 }
 0x2de   : > { %p1144_p7 = pnand %p1143_p5, %p1139_p8 }
 0x2e0   : > { %1147 = shalt.err (!%p1144_p7)
}
 0x2e1   : > { %s1203_s17 = smov 64   ;;  %s1204_s27 = smov 4  }
 0x2e2   : > { %927 = dma.vmem_to_hbm [thread:$0]  (%p1480_p1), %s1408_s15, 256, %s1413_s14, %s654_s9, %s1203_s17, %s1203_s17, %s1204_s27  }
 0x2e3 PF: > { %s682_s13 = sand.u32 1, %s1182_s18   ;;  %p1481_p12 = scmp.ne.s32.totalorder %s1468_s25, 0 }
 0x2e4   : > { %p1482_p9 = scmp.ge.s32.totalorder %s1194_s21, 2  ;;  %s683_s16 = scalar_lea.sflag [#allocation4], %s682_s13 }
 0x2e6   : > { %p944_p13 = pnand %p1482_p9, %p1481_p12 }
 0x2e8   : > { %p945_p0 = pneg %p944_p13 }
 0x2ea   : > { %1177 = dma.done.wait (%p945_p0), %s683_s16, 256  }
 0x2eb   : > { %1179 = vsyncadd (%p945_p0), %s683_s16, 4294967040  ;;  %p20_p2 = scmp.ge.s32.totalorder %s1324_s28, 4   ;;  %s1483_s18 = smov %s1186_s19 }
 0x2ec   : > { %s1484_s19 = smov %s1190_s20  ;;  %s1485_s20 = smov %s1334_s6 }
 0x2ed   : > { %s1486_s21 = smov %s1324_s28  ;;  %22 = sbr.rel (!%p20_p2) target bundleno = 7 (0x7), region = 97 }
 0x2f2   :  { %688 = vsyncpa [#allocation3], 1 }
 0x2f3   :  { %690 = vsyncpa [#allocation3 + $0x1], 1 }
 0x2f4   :  { %691 = vsyncpa [#allocation6], 1 }
 0x2f5   :  { %692 = vsyncpa [#allocation9], 1 }
 0x2f6   :  { %693 = vsyncpa [#allocation4], 1 }
 0x2f7   :  { %695 = vsyncpa [#allocation4 + $0x1], 1 }

</bundles_post_ra>
